<compile_context>
chip_gen: v6e
topology: v6e:2x2x1
jax: 0.10.0
libtpu: 0.0.40
codegen_flags: <defaults>
</compile_context>

<pallas_src>
import jax
import jax.numpy as jnp
from jax.experimental import pallas as pl
from jax.experimental.pallas import tpu as pltpu

# --- config (small, consistent with the module) ------------------------------
B, S = 2, 8
HIDDEN = 32          # config.hidden_size
INTER = 64           # config.intermediate_size
LN_EPS = 1e-12       # config.layer_norm_eps


# --- Pallas kernel: whole (tiny) batch in one invocation ----------------------
def gutnet_output_kernel(h_ref, res_ref, w_ref, p_ref, out_ref):
    # h_ref   : (rows, INTER)    flattened intermediate activations
    # res_ref : (rows, HIDDEN)   residual (input_tensor)
    # w_ref   : (INTER, HIDDEN)  dense weight (already transposed to in x out)
    # p_ref   : (3, HIDDEN)      rows = [bias, ln_gamma, ln_beta]
    # out_ref : (rows, HIDDEN)
    h = h_ref[...]
    w = w_ref[...]
    res = res_ref[...]
    p = p_ref[...]
    bias, gamma, beta = p[0:1, :], p[1:2, :], p[2:3, :]

    # dense projection (single MXU pass); dropout is identity at inference
    y = jnp.dot(h, w, preferred_element_type=jnp.float32) + bias
    z = y + res

    # LayerNorm over the real hidden width (derived from the tile shape,
    # so there is no module-constant / shape mismatch hazard).
    hdim = z.shape[-1]
    inv_h = 1.0 / hdim
    mu = jnp.sum(z, axis=-1, keepdims=True) * inv_h
    zc = z - mu
    var = jnp.sum(zc * zc, axis=-1, keepdims=True) * inv_h
    out = zc * jax.lax.rsqrt(var + LN_EPS) * gamma + beta
    out_ref[...] = out.astype(out_ref.dtype)


# --- one-time parameter packing (hoisted out of the per-call hot path) --------
def prepare_params(params):
    packed = jnp.stack([params['b'], params['gamma'], params['beta']])  # (3, HIDDEN)
    return params['w'], packed


# --- wrapper ------------------------------------------------------------------
def gutnet_output(hidden_states, input_tensor, w, packed):
    b, s, inter = hidden_states.shape
    hdim = input_tensor.shape[-1]
    rows = b * s

    # flatten batch*seq (contiguous reshape, effectively free); no padding,
    # no per-call packing, no output slice.
    h2d = hidden_states.reshape(rows, inter)
    res2d = input_tensor.reshape(rows, hdim)

    vmem = pl.BlockSpec(memory_space=pltpu.MemorySpace.VMEM)
    out = pl.pallas_call(
        gutnet_output_kernel,
        out_shape=jax.ShapeDtypeStruct((rows, hdim), jnp.float32),
        in_specs=[vmem, vmem, vmem, vmem],
        out_specs=vmem,
    )(h2d, res2d, w, packed)

    return out.reshape(b, s, hdim)


gutnet_output_jit = jax.jit(gutnet_output)


# --- deterministic parameter init (mirrors nn.Linear / nn.LayerNorm) ----------
def init_params(key):
    bound = 1.0 / (INTER ** 0.5)          # PyTorch nn.Linear default init range
    kw, kb = jax.random.split(key)
    return {
        'w': jax.random.uniform(kw, (INTER, HIDDEN), jnp.float32, -bound, bound),
        'b': jax.random.uniform(kb, (HIDDEN,), jnp.float32, -bound, bound),
        'gamma': jnp.ones((HIDDEN,), jnp.float32),
        'beta': jnp.zeros((HIDDEN,), jnp.float32),
    }


# --- pure-JAX reference for a correctness sanity check -------------------------
def reference(hidden_states, input_tensor, p):
    y = hidden_states @ p['w'] + p['b']
    z = y + input_tensor                    # dropout = identity
    mu = jnp.mean(z, axis=-1, keepdims=True)
    var = jnp.mean((z - mu) ** 2, axis=-1, keepdims=True)
    return (z - mu) / jnp.sqrt(var + LN_EPS) * p['gamma'] + p['beta']


if __name__ == "__main__":
    key = jax.random.PRNGKey(0)
    kh, kr, kp = jax.random.split(key, 3)
    hidden_states = jax.random.normal(kh, (B, S, INTER), jnp.float32)
    input_tensor = jax.random.normal(kr, (B, S, HIDDEN), jnp.float32)
    params = init_params(kp)

    w, packed = prepare_params(params)      # one-time packing, outside hot path
    out = gutnet_output_jit(hidden_states, input_tensor, w, packed)
    out = jax.block_until_ready(out)

    ref = reference(hidden_states, input_tensor, params)
    assert out.shape == (B, S, HIDDEN)
    assert jnp.allclose(out, ref, atol=1e-4, rtol=1e-4), "mismatch vs reference"

    print("KERNEL_OK")
</pallas_src>

<mosaic_0001>
module attributes {stable_mosaic.version = 11 : i64} {
  func.func @gutnet_output_kernel(%arg0: memref<16x64xf32, #tpu.memory_space<vmem>>, %arg1: memref<16x32xf32, #tpu.memory_space<vmem>>, %arg2: memref<64x32xf32, #tpu.memory_space<vmem>>, %arg3: memref<3x32xf32, #tpu.memory_space<vmem>>, %arg4: memref<16x32xf32, #tpu.memory_space<vmem>>) attributes {dimension_semantics = [], scalar_prefetch = 0 : i64, scratch_operands = 0 : i64, tpu.core_type = #tpu.core_type<tc>} {
    %c0 = arith.constant 0 : index
    %c0_0 = arith.constant 0 : index
    %0 = vector.load %arg0[%c0, %c0_0] : memref<16x64xf32, #tpu.memory_space<vmem>>, vector<16x64xf32>
    %c0_1 = arith.constant 0 : index
    %c0_2 = arith.constant 0 : index
    %1 = vector.load %arg2[%c0_1, %c0_2] : memref<64x32xf32, #tpu.memory_space<vmem>>, vector<64x32xf32>
    %c0_3 = arith.constant 0 : index
    %c0_4 = arith.constant 0 : index
    %2 = vector.load %arg1[%c0_3, %c0_4] : memref<16x32xf32, #tpu.memory_space<vmem>>, vector<16x32xf32>
    %c0_5 = arith.constant 0 : index
    %c0_6 = arith.constant 0 : index
    %3 = vector.load %arg3[%c0_5, %c0_6] : memref<3x32xf32, #tpu.memory_space<vmem>>, vector<3x32xf32>
    %4 = vector.extract_strided_slice %3 {offsets = [0, 0], sizes = [1, 32], strides = [1, 1]} : vector<3x32xf32> to vector<1x32xf32>
    %5 = vector.extract_strided_slice %3 {offsets = [1, 0], sizes = [1, 32], strides = [1, 1]} : vector<3x32xf32> to vector<1x32xf32>
    %6 = vector.extract_strided_slice %3 {offsets = [2, 0], sizes = [1, 32], strides = [1, 1]} : vector<3x32xf32> to vector<1x32xf32>
    %cst = arith.constant dense<0.000000e+00> : vector<16x32xf32>
    %7 = tpu.matmul %0, %1, %cst {dimension_numbers = #tpu.dot_dimension_numbers<[1], [0], [0], [1], [0, 0, 1, 1], [], []>} : vector<16x64xf32>, vector<64x32xf32>, vector<16x32xf32> -> vector<16x32xf32>
    %8 = vector.broadcast %4 : vector<1x32xf32> to vector<16x32xf32>
    %9 = arith.addf %7, %8 : vector<16x32xf32>
    %10 = arith.addf %9, %2 : vector<16x32xf32>
    %cst_7 = arith.constant dense<0.000000e+00> : vector<16xf32>
    %11 = vector.multi_reduction <add>, %10, %cst_7 [1] : vector<16x32xf32> to vector<16xf32>
    %12 = vector.shape_cast %11 : vector<16xf32> to vector<16x1xf32>
    %cst_8 = arith.constant 3.125000e-02 : f32
    %13 = vector.broadcast %cst_8 : f32 to vector<16x1xf32>
    %14 = arith.mulf %12, %13 : vector<16x1xf32>
    %15 = vector.broadcast %14 : vector<16x1xf32> to vector<16x32xf32>
    %16 = arith.subf %10, %15 : vector<16x32xf32>
    %17 = arith.mulf %16, %16 : vector<16x32xf32>
    %cst_9 = arith.constant dense<0.000000e+00> : vector<16xf32>
    %18 = vector.multi_reduction <add>, %17, %cst_9 [1] : vector<16x32xf32> to vector<16xf32>
    %19 = vector.shape_cast %18 : vector<16xf32> to vector<16x1xf32>
    %cst_10 = arith.constant 3.125000e-02 : f32
    %20 = vector.broadcast %cst_10 : f32 to vector<16x1xf32>
    %21 = arith.mulf %19, %20 : vector<16x1xf32>
    %cst_11 = arith.constant 9.99999996E-13 : f32
    %22 = vector.broadcast %cst_11 : f32 to vector<16x1xf32>
    %23 = arith.addf %21, %22 : vector<16x1xf32>
    %24 = math.rsqrt %23 : vector<16x1xf32>
    %25 = vector.broadcast %24 : vector<16x1xf32> to vector<16x32xf32>
    %26 = arith.mulf %16, %25 : vector<16x32xf32>
    %27 = vector.broadcast %5 : vector<1x32xf32> to vector<16x32xf32>
    %28 = arith.mulf %26, %27 : vector<16x32xf32>
    %29 = vector.broadcast %6 : vector<1x32xf32> to vector<16x32xf32>
    %30 = arith.addf %28, %29 : vector<16x32xf32>
    %c0_12 = arith.constant 0 : index
    %c0_13 = arith.constant 0 : index
    %31 = vector.load %arg4[%c0_12, %c0_13] : memref<16x32xf32, #tpu.memory_space<vmem>>, vector<16x32xf32>
    tpu.vector_store %arg4[%c0_12, %c0_13], %30 {strides = array<i32>} : memref<16x32xf32, #tpu.memory_space<vmem>>, vector<16x32xf32>,
    return
  }
}

</mosaic_0001>

<bundles_post_ra>
// kernel: gutnet_output.1
= control target key start
LH: loop header
LB: loop body
LE: loop exit
PB: predicated region body
PF: predicated region fallthrough
CT: control target
= control target key end

     0   :  { %vm35_vm0 = vcmask 523264   ;;  %s314_s0 = inlined_call_operand.vmem [shape: f32[16,64], index: 0, kind: input, shape index: {}]   ;;  %s315_s1 = inlined_call_operand.vmem [shape: f32[16,32], index: 1, kind: input, shape index: {}]   ;;  %s316_s2 = inlined_call_operand.vmem [shape: f32[64,32], index: 2, kind: input, shape index: {}]   ;;  %s317_s3 = inlined_call_operand.vmem [shape: f32[3,32], index: 3, kind: input, shape index: {}]   ;;  %s318_s4 = inlined_call_operand.hbm [shape: f32[16,32], index: 4, kind: output, shape index: {}]  }
   0x1   :  { %v27_v0 = vld [vmem:[%s316_s2 + $0x38] sm:$0xff]  ;;  %v26_v1 = vld [vmem:[%s316_s2 + $0x30] sm:$0xff]  ;;  %v25_v2 = vld [vmem:[%s316_s2 + $0x28] sm:$0xff] }
   0x2   :  { %188 = vmatprep.subr.mxu0 %v27_v0  ;;  %v18_v3 = vld [vmem:[%s314_s0] sm:$0xff] }
   0x3   :  { %189 = vmatpush3.msra.mxu0 %v27_v0  ;;  %204 = vmatprep.mubr.msk.f32.mxu0 %vm35_vm0, %v18_v3 }
   0x4   :  { %190 = vmatprep.subr.mxu0 %v26_v1 }
   0x5   :  { %9 = vsyncpa [#allocation3], 0  ;;  %191 = vmatpush3.msra.mxu0 %v26_v1  ;;  %v24_v4 = vld [vmem:[%s316_s2 + $0x20] sm:$0xff]  ;;  %v23_v5 = vld [vmem:[%s316_s2 + $0x18] sm:$0xff]  ;;  %v31_v10 = vlaneseq  ;;  %vm119_vm1 = vcmask 261120  }
   0x6   :  { %192 = vmatprep.subr.mxu0 %v25_v2  ;;  %v22_v6 = vld [vmem:[%s316_s2 + $0x10] sm:$0xff]  ;;  %v21_v7 = vld [vmem:[%s316_s2 + $0x8] sm:$0xff]  ;;  %v20_v8 = vld [vmem:[%s316_s2] sm:$0xff] }
   0x7   :  { %193 = vmatpush3.msra.mxu0 %v25_v2  ;;  %v19_v9 = vld [vmem:[%s314_s0 + $0x8] sm:$0xff]  ;;  %v32_v11 = vshrl.u32 %v31_v10, 7  ;;  %v30_v13 = vld [vmem:[%s317_s3] sm:$0x7] }
   0x8   :  { %194 = vmatprep.subr.mxu0 %v24_v4  ;;  %v28_v17 = vld [vmem:[%s315_s1] sm:$0xff]  ;;  %v29_v20 = vld [vmem:[%s315_s1 + $0x8] sm:$0xff]  ;;  %s236_s1 = smov [#allocation2]  }
   0x9   :  { %195 = vmatpush3.msra.mxu0 %v24_v4  ;;  %v33_v12 = vsub.s32 0, %v32_v11  ;;  %v148_v41 = vsub.s32 1, %v32_v11  ;;  %v154_v42 = vsub.s32 2, %v32_v11  ;;  %s165_s3 = sshll.u32 %s236_s1, 4  ;;  %s166_s3 = int_to_ptr.vmem [resolvable:$true] %s165_s3 }
   0xa   :  { %196 = vmatprep.subr.mxu0 %v23_v5  ;;  %s214_s13 = scalar_lea.vmem %s166_s3, 256  ;;  %p219_p1 = scmp.lt.s32.totalorder %s166_s3, %s166_s3 }
   0xb   :  { %197 = vmatpush3.msra.mxu0 %v23_v5  ;;  %v34_v14 = vrot.slane %v30_v13, %v33_v12  ;;  %v149_v43 = vrot.slane %v30_v13, %v148_v41  ;;  %v155_v45 = vrot.slane %v30_v13, %v154_v42  ;;  %p215_p0 = scmp.ne.s32.totalorder %s166_s3, %s214_s13  ;;  %p220_p2 = scmp.lt.s32.totalorder %s214_s13, %s214_s13 }
   0xc   :  { %198 = vmatprep.subr.mxu0 %v22_v6 }
   0xd   :  { %199 = vmatpush3.msra.mxu0 %v22_v6  ;;  %p221_p3 = por %p220_p2, %p219_p1 }
   0xe   :  { %200 = vmatprep.subr.mxu0 %v21_v7 }
   0xf   :  { %201 = vmatpush3.msra.mxu0 %v21_v7  ;;  %p222_p4 = pnand %p221_p3, %p215_p0 }
  0x10   :  { %202 = vmatprep.subr.mxu0 %v20_v8 }
  0x11   :  { %203 = vmatpush3.msra.mxu0 %v20_v8 }
  0x12   :  { %205 = vmatmul.mubr.msk.f32.vlgmr.msra.gmra.mxu0 %vm35_vm0, %v19_v9 }
  0xd2   :  { %v206_v15 = vpop.f32.mrf.mxu0 }
  0xd3   :  { %v114_v18 = vadd.f32 %v206_v15, %v34_v14 }
  0xd4   :  { %v108_v16 = vpop.f32.mrf.mxu0 }
  0xd5   :  { %v109_v19 = vadd.f32 %v108_v16, %v34_v14  ;;  %v118_v23 = vadd.f32 %v114_v18, %v29_v20 }
  0xd7   :  { %v117_v21 = vadd.f32 %v109_v19, %v28_v17  ;;  %v123_v24 = vsel %vm119_vm1, %v118_v23, 0.0 }
  0xd9   :  { %v120_v22 = vsel %vm119_vm1, %v117_v21, 0.0 }
  0xda   :  { %121 = vadd.xlane.f32.xlu0 %v120_v22 }
  0xde   :  { %124 = vadd.xlane.f32.xlu0 %v123_v24 }
 0x163   :  { %v122_v25 = vpop.xlane.xlu0 %121 }
 0x164   :  { %v126_v26 = vmul.f32 0.03125, %v122_v25 }
 0x166   :  { %v128_v27 = vsub.f32 %v117_v21, %v126_v26 }
 0x167   :  { %v125_v28 = vpop.xlane.xlu0 %124 }
 0x168   :  { %v127_v29 = vmul.f32 0.03125, %v125_v28  ;;  %v130_v30 = vmul.f32 %v128_v27, %v128_v27 }
 0x16a   :  { %v129_v31 = vsub.f32 %v118_v23, %v127_v29  ;;  %v132_v32 = vsel %vm119_vm1, %v130_v30, 0.0 }
 0x16b   :  { %133 = vadd.xlane.f32.xlu1 %v132_v32 }
 0x16c   :  { %v131_v33 = vmul.f32 %v129_v31, %v129_v31 }
 0x16e   :  { %v135_v34 = vsel %vm119_vm1, %v131_v33, 0.0 }
 0x16f   :  { %136 = vadd.xlane.f32.xlu1 %v135_v34 }
 0x1f4   :  { %v134_v35 = vpop.xlane.xlu1 %133 }
 0x1f5   :  { %v138_v36 = vmul.f32 0.03125, %v134_v35 }
 0x1f7   :  { %v140_v37 = vadd.f32 1e-12, %v138_v36 }
 0x1f8   :  { %v137_v38 = vpop.xlane.xlu1 %136 }
 0x1f9   :  { %210 = vrsqrt.f32 %v140_v37  ;;  %v139_v39 = vmul.f32 0.03125, %v137_v38 }
 0x1fb   :  { %v141_v40 = vadd.f32 1e-12, %v139_v39 }
 0x1fd   :  { %212 = vrsqrt.f32 %v141_v40 }
 0x206   :  { %v211_v44 = vpop.eup %210 }
 0x207   :  { %v144_v46 = vmul.f32 %v211_v44, %v128_v27 }
 0x209   :  { %v150_v47 = vmul.f32 %v149_v43, %v144_v46 }
 0x20a   :  { %v213_v48 = vpop.eup %212 }
 0x20b   :  { %v145_v49 = vmul.f32 %v213_v48, %v129_v31  ;;  %v156_v50 = vadd.f32 %v155_v45, %v150_v47 }
 0x20d   :  { %v151_v51 = vmul.f32 %v149_v43, %v145_v49  ;;  %158 = vst.msk [vmem:[#allocation2] sm:$0xff] %vm119_vm1, %v156_v50 }
 0x20f   :  { %v157_v52 = vadd.f32 %v155_v45, %v151_v51 }
 0x211   :  { %159 = vst.msk [vmem:[#allocation2 + $0x8] sm:$0xff] %vm119_vm1, %v157_v52 }
 0x212   :  { %225 = shalt.err (!%p222_p4)
}
 0x213   :  { %s237_s14 = smov 128   ;;  %s238_s15 = smov 8  }
 0x214   :  { %171 = dma.vmem_to_hbm [thread:$0]  %s166_s3, 256, %s318_s4, [#allocation3], %s237_s14, %s237_s14, %s238_s15  }
 0x215   :  { %234 = dma.done.wait [#allocation3], 256  }
 0x216   :  { %235 = vsyncadd [#allocation3], 4294967040 }
 0x217   :  { %175 = vsyncpa [#allocation3], 1 }

</bundles_post_ra>
